<compile_context>
chip_gen: v7x
topology: tpu7x:2x2x1
jax: 0.10.0
libtpu: 0.0.40
codegen_flags: <defaults>
</compile_context>

<pallas_src>
import math

import jax
import jax.numpy as jnp
from jax.experimental import pallas as pl
from jax.experimental.pallas import tpu as pltpu


def _round_up(x: int, m: int) -> int:
    return ((x + m - 1) // m) * m


def _cdiv(a: int, b: int) -> int:
    return -(-a // b)


def _sublane_multiple(dtype) -> int:
    # f32 -> 8, bf16/f16 -> 16, int8/fp8 -> 32
    return max(8, 32 // max(1, jnp.dtype(dtype).itemsize))


def _sinusoidal_pe_kernel(tab_ref, xyz_ref, out_ref):
    # tab_ref: (8, hidden_dim) resident tables: rows 0..3 = wx, wy, wz, phase-offset.
    # xyz_ref: (block_n, 3) point coordinates for this grid step.
    # out_ref: (block_n, hidden_dim) output tile.
    xyz = xyz_ref[...]                                   # (block_n, 3) f32
    wx = tab_ref[0:1, :]                                 # (1, hidden_dim)
    wy = tab_ref[1:2, :]
    wz = tab_ref[2:3, :]
    off = tab_ref[3:4, :]
    # Lane-dense phase over the whole hidden_dim; one transcendental per element.
    phase = xyz[:, 0:1] * wx + xyz[:, 1:2] * wy + xyz[:, 2:3] * wz + off
    out_ref[...] = jnp.sin(phase).astype(out_ref.dtype)  # cos(x) == sin(x + pi/2)


def sinusoidal_positional_encoding(xyz_pos,
                                   hidden_dim,
                                   min_timescale: float = 1.0,
                                   max_timescale: float = 10000.0,
                                   block_n: int = 1024,
                                   out_dtype=jnp.float32,
                                   vmem_budget_bytes: int = 8 * 1024 * 1024):
    """Pallas equivalent of SinusoidalPositionalEncoding.forward(xyz_pos, hidden_dim)."""
    assert hidden_dim % 6 == 0
    num_ts = hidden_dim // 6
    assert num_ts > 1, "hidden_dim must be >= 12 (reference divides by num_timescales - 1)"

    N = int(xyz_pos.shape[0])
    out_itemsize = jnp.dtype(out_dtype).itemsize
    log_inc = math.log(float(max_timescale) / float(min_timescale)) / float(num_ts - 1)

    # ---- per-column tables (computed once, tiny) -----------------------------------
    col = jnp.arange(hidden_dim, dtype=jnp.int32)
    ts = (col % num_ts).astype(jnp.float32)
    group = col // num_ts                 # 0..5 -> [sin_x, cos_x, sin_y, cos_y, sin_z, cos_z]
    axis = group // 2                     # 0:x, 1:y, 2:z
    is_cos = (group % 2).astype(jnp.float32)
    inv_ts = jnp.float32(min_timescale) * jnp.exp(ts * jnp.float32(-log_inc))
    wx = jnp.where(axis == 0, inv_ts, 0.0)
    wy = jnp.where(axis == 1, inv_ts, 0.0)
    wz = jnp.where(axis == 2, inv_ts, 0.0)
    off = is_cos * jnp.float32(math.pi / 2.0)
    table = jnp.zeros((8, hidden_dim), jnp.float32)
    table = table.at[0, :].set(wx).at[1, :].set(wy).at[2, :].set(wz).at[3, :].set(off)

    # ---- tile sizing ----------------------------------------------------------------
    sub = _sublane_multiple(out_dtype)
    lane = 128
    out_row_bytes = _round_up(hidden_dim, lane) * out_itemsize   # VMEM lane-padded
    xyz_row_bytes = lane * 4                                     # (block_n, 3) lane-padded
    row_bytes = 2 * (out_row_bytes + xyz_row_bytes)              # double-buffered in + out
    max_rows = max(sub, (vmem_budget_bytes // row_bytes) // sub * sub)
    block_n_eff = min(block_n, max_rows)
    # Keep >= ~4 grid steps when N allows so v7x can shard rows across both TensorCores.
    min_steps = 4
    per_step_rows = _round_up(max(1, _cdiv(N, min_steps)), sub)
    block_n_eff = min(block_n_eff, per_step_rows)
    block_n_eff = max(sub, (block_n_eff // sub) * sub)

    # Explicit VMEM limit (needed tiles + headroom), safe on v5e (16 MiB scoped default)
    # and v7x (64 MiB physical).
    table_bytes = 8 * _round_up(hidden_dim, lane) * 4
    vmem_needed = block_n_eff * row_bytes + 2 * table_bytes
    vmem_limit_bytes = int(min(60 * 2**20, max(4 * 2**20, 2 * vmem_needed + (1 << 20))))

    # ---- ragged N: pad rows to a multiple of the tile, slice back afterwards ---------
    n_pad = _round_up(max(N, 1), block_n_eff)
    xyz = xyz_pos.astype(jnp.float32)
    if n_pad != N:
        xyz = jnp.pad(xyz, ((0, n_pad - N), (0, 0)))

    grid = (n_pad // block_n_eff,)

    out = pl.pallas_call(
        _sinusoidal_pe_kernel,
        out_shape=jax.ShapeDtypeStruct((n_pad, hidden_dim), out_dtype),
        grid=grid,
        in_specs=[
            # Tiny per-column tables: constant block index -> fetched once, stays resident.
            pl.BlockSpec((8, hidden_dim), lambda i: (0, 0)),
            # xyz tiled per grid step; pipelines behind the output writeback.
            pl.BlockSpec((block_n_eff, 3), lambda i: (i, 0)),
        ],
        out_specs=pl.BlockSpec((block_n_eff, hidden_dim), lambda i: (i, 0)),
        compiler_params=pltpu.CompilerParams(
            dimension_semantics=("parallel",),
            vmem_limit_bytes=vmem_limit_bytes,
        ),
        cost_estimate=pl.CostEstimate(
            flops=int(6 * n_pad * hidden_dim),
            transcendentals=int(n_pad * hidden_dim),
            bytes_accessed=int(n_pad * hidden_dim * out_itemsize
                               + n_pad * 3 * 4 + 8 * hidden_dim * 4),
        ),
    )(table, xyz)

    if n_pad != N:
        out = out[:N]
    return out


def _reference(xyz_pos, hidden_dim, min_timescale=1.0, max_timescale=10000.0):
    T = hidden_dim // 6
    log_inc = math.log(float(max_timescale) / float(min_timescale)) / float(T - 1)
    inv_ts = min_timescale * jnp.exp(jnp.arange(T, dtype=jnp.float32) * -log_inc)
    sx = xyz_pos[:, 0:1] * inv_ts[None, :]
    sy = xyz_pos[:, 1:2] * inv_ts[None, :]
    sz = xyz_pos[:, 2:3] * inv_ts[None, :]
    return jnp.concatenate(
        [jnp.sin(sx), jnp.cos(sx), jnp.sin(sy), jnp.cos(sy), jnp.sin(sz), jnp.cos(sz)],
        axis=-1)


if __name__ == "__main__":
    key = jax.random.PRNGKey(0)
    N, hidden_dim = 64, 48  # hidden_dim % 6 == 0 -> 8 timescales
    xyz = jax.random.uniform(key, (N, 3), dtype=jnp.float32, minval=-50.0, maxval=50.0)

    out = jax.block_until_ready(sinusoidal_positional_encoding(xyz, hidden_dim))
    ref = _reference(xyz, hidden_dim)
    assert out.shape == (N, hidden_dim)
    assert jnp.allclose(out, ref, atol=1e-5, rtol=1e-5)

    # Ragged N forcing padding + a multi-step grid (also exercises the small-tile path).
    N2 = 100
    xyz2 = jax.random.uniform(jax.random.PRNGKey(1), (N2, 3), dtype=jnp.float32,
                              minval=-50.0, maxval=50.0)
    out2 = jax.block_until_ready(
        sinusoidal_positional_encoding(xyz2, hidden_dim, block_n=32))
    assert out2.shape == (N2, hidden_dim)
    assert jnp.allclose(out2, _reference(xyz2, hidden_dim), atol=1e-5, rtol=1e-5)

    print("KERNEL_OK")
</pallas_src>

<mosaic_0001>
module attributes {stable_mosaic.version = 11 : i64} {
  func.func @_sinusoidal_pe_kernel(%arg0: i32, %arg1: memref<8x48xf32, #tpu.memory_space<vmem>>, %arg2: memref<16x3xf32, #tpu.memory_space<vmem>>, %arg3: memref<16x48xf32, #tpu.memory_space<vmem>>) attributes {dimension_semantics = [#tpu.dimension_semantics<parallel>], iteration_bounds = array<i64: 4>, scalar_prefetch = 0 : i64, scratch_operands = 0 : i64, tpu.core_type = #tpu.core_type<tc>, window_params = [{pipeline_mode = #tpu.pipeline_mode<synchronous>, transform_indices = @transform_0, window_bounds = array<i64: 8, 48>}, {transform_indices = @transform_1, window_bounds = array<i64: 16, 3>}, {transform_indices = @transform_2, window_bounds = array<i64: 16, 48>}]} {
    %c0 = arith.constant 0 : index
    %c0_0 = arith.constant 0 : index
    %0 = vector.load %arg2[%c0, %c0_0] : memref<16x3xf32, #tpu.memory_space<vmem>>, vector<16x3xf32>
    %c0_1 = arith.constant 0 : index
    %c0_2 = arith.constant 0 : index
    %1 = vector.load %arg1[%c0_1, %c0_2] : memref<8x48xf32, #tpu.memory_space<vmem>>, vector<1x48xf32>
    %c1 = arith.constant 1 : index
    %c0_3 = arith.constant 0 : index
    %2 = vector.load %arg1[%c1, %c0_3] : memref<8x48xf32, #tpu.memory_space<vmem>>, vector<1x48xf32>
    %c2 = arith.constant 2 : index
    %c0_4 = arith.constant 0 : index
    %3 = vector.load %arg1[%c2, %c0_4] : memref<8x48xf32, #tpu.memory_space<vmem>>, vector<1x48xf32>
    %c3 = arith.constant 3 : index
    %c0_5 = arith.constant 0 : index
    %4 = vector.load %arg1[%c3, %c0_5] : memref<8x48xf32, #tpu.memory_space<vmem>>, vector<1x48xf32>
    %5 = vector.extract_strided_slice %0 {offsets = [0, 0], sizes = [16, 1], strides = [1, 1]} : vector<16x3xf32> to vector<16x1xf32>
    %6 = vector.broadcast %5 : vector<16x1xf32> to vector<16x48xf32>
    %7 = vector.broadcast %1 : vector<1x48xf32> to vector<16x48xf32>
    %8 = arith.mulf %6, %7 : vector<16x48xf32>
    %9 = vector.extract_strided_slice %0 {offsets = [0, 1], sizes = [16, 1], strides = [1, 1]} : vector<16x3xf32> to vector<16x1xf32>
    %10 = vector.broadcast %9 : vector<16x1xf32> to vector<16x48xf32>
    %11 = vector.broadcast %2 : vector<1x48xf32> to vector<16x48xf32>
    %12 = arith.mulf %10, %11 : vector<16x48xf32>
    %13 = arith.addf %8, %12 : vector<16x48xf32>
    %14 = vector.extract_strided_slice %0 {offsets = [0, 2], sizes = [16, 1], strides = [1, 1]} : vector<16x3xf32> to vector<16x1xf32>
    %15 = vector.broadcast %14 : vector<16x1xf32> to vector<16x48xf32>
    %16 = vector.broadcast %3 : vector<1x48xf32> to vector<16x48xf32>
    %17 = arith.mulf %15, %16 : vector<16x48xf32>
    %18 = arith.addf %13, %17 : vector<16x48xf32>
    %19 = vector.broadcast %4 : vector<1x48xf32> to vector<16x48xf32>
    %20 = arith.addf %18, %19 : vector<16x48xf32>
    %21 = math.sin %20 : vector<16x48xf32>
    %c0_6 = arith.constant 0 : index
    %c0_7 = arith.constant 0 : index
    %22 = vector.load %arg3[%c0_6, %c0_7] : memref<16x48xf32, #tpu.memory_space<vmem>>, vector<16x48xf32>
    tpu.vector_store %arg3[%c0_6, %c0_7], %21 {strides = array<i32>} : memref<16x48xf32, #tpu.memory_space<vmem>>, vector<16x48xf32>,
    return
  }
  func.func @transform_0(%arg0: i32) -> (i32, i32) {
    %c0_i32 = arith.constant 0 : i32
    %c0_i32_0 = arith.constant 0 : i32
    %c0_i32_1 = arith.constant 0 : i32
    return %c0_i32, %c0_i32_0 : i32, i32
  }
  func.func @transform_1(%arg0: i32) -> (i32, i32) {
    %c0_i32 = arith.constant 0 : i32
    %c0_i32_0 = arith.constant 0 : i32
    return %arg0, %c0_i32 : i32, i32
  }
  func.func @transform_2(%arg0: i32) -> (i32, i32) {
    %c0_i32 = arith.constant 0 : i32
    %c0_i32_0 = arith.constant 0 : i32
    return %arg0, %c0_i32 : i32, i32
  }
}

</mosaic_0001>

<bundles_post_ra>
// kernel: tpu_custom_call.1
= control target key start
LH: loop header
LB: loop body
LE: loop exit
PB: predicated region body
PF: predicated region fallthrough
CT: control target
= control target key end

     0   :  { %s568_s9 = smov 0   ;;  %s668_s0 = inlined_call_operand.vmem [shape: f32[8,48], index: 0, kind: input, shape index: {}]   ;;  %s669_s1 = inlined_call_operand.vmem [shape: f32[64,3], index: 1, kind: input, shape index: {}]   ;;  %s670_s2 = inlined_call_operand.vmem [shape: f32[64,48], index: 2, kind: output, shape index: {}]  }
   0x1 LB: > { %s474_s10 = sadd.s32 4294967295, %s542_s9   ;;  %p478_p0 = scmp.ge.s32.totalorder %s542_s9, 1  ;;  %s542_s9 = sphi %s568_s9, %s12_s9  }
   0x2   : > { %p113_p1 = scmp.lt.s32.totalorder %s542_s9, 5 }
   0x4   : > { %p114_p2 = pnand %p478_p0, %p113_p1 }
   0x5   : > { %s479_s11 = sshll.u32 (!%p114_p2), %s474_s10, 1  ;;  %v544_v0 = vmov (!%p114_p2), 0   ;;  %v545_v3 = vmov (!%p114_p2), 1   ;;  %v546_v4 = vmov (!%p114_p2), 2   ;;  %v484_v7 = vld [vmem:[%s668_s0 + $0x1] ss:$0 sm:$0xff] (!%p114_p2) }
   0x6   : > { %117 = sbr.rel (%p114_p2) target bundleno = 251 (0xfb), region = 28  ;;  %524 = vset.pattern.permute.xlu1 (!%p114_p2), %v544_v0  ;;  %522 = vset.pattern.permute.xlu0 (!%p114_p2), %v544_v0  ;;  %p136_p3 = scmp.lt.s32.totalorder (!%p114_p2), %s479_s11, 7  ;;  %v483_v10 = vld [vmem:[%s668_s0] ss:$0 sm:$0xff] (!%p114_p2)  ;;  %v485_v13 = vld [vmem:[%s668_s0 + $0x2] ss:$0 sm:$0xff] (!%p114_p2) }
   0x7   : > { %v486_v22 = vld [vmem:[%s668_s0 + $0x3] ss:$0 sm:$0xff] (!%p114_p2)  ;;  %v547_v47 = vmov (!%p114_p2), 683565275   ;;  %v548_v51 = vmov (!%p114_p2), 2475754826  }
   0x8   : > { %v549_v53 = vmov (!%p114_p2), 2131351028   ;;  %v550_v55 = vmov (!%p114_p2), 2102212464   ;;  %v551_v57 = vmov (!%p114_p2), 920167782  }
   0x9   : > { %v552_v0 = vmov (!%p114_p2), 1326507024  }
   0xd   : > { %s672_s11 = smov (!%p136_p3, %s479_s11), 7 }
   0xe   : > { %s480_s12 = sshll.u32 %s672_s11, 3 }
   0xf   : > { %s139_s15 = scalar_lea.vmem %s669_s1, %s480_s12  ;;  %s145_s26 = scalar_lea.vmem %s670_s2, %s480_s12 }
  0x10   : > { %v148_v1 = vld [vmem:[%s139_s15 + $0x8] sm:$0xff]  ;;  %v147_v2 = vld [vmem:[%s139_s15] sm:$0xff] }
  0x11   : > { %160 = vperm.xlu1 %524, %v148_v1   ;;  %155 = vperm.xlu0 %522, %v147_v2  }
  0x15   : > { %525 = vset.pattern.permute.xlu1 %v545_v3  ;;  %523 = vset.pattern.permute.xlu0 %v545_v3 }
  0x16   : > { %174 = vperm.xlu1 %525, %v148_v1   ;;  %170 = vperm.xlu0 %523, %v147_v2  }
  0x1a   : > { %526 = vset.pattern.permute.xlu1 %v546_v4  ;;  %527 = vset.pattern.permute.xlu0 %v546_v4 }
  0x1b   : > { %186 = vperm.xlu1 %526, %v147_v2   ;;  %190 = vperm.xlu0 %527, %v148_v1  }
  0x90   : > { %v161_v5 = vpop.permute.xlu1 %160  ;;  %v156_v6 = vpop.permute.xlu0 %155 }
  0x91   : > { %v168_v14 = vmul.f32 %v483_v10, %v161_v5  ;;  %v167_v15 = vmul.f32 %v483_v10, %v156_v6 }
  0x95   : > { %v175_v8 = vpop.permute.xlu1 %174  ;;  %v171_v9 = vpop.permute.xlu0 %170 }
  0x96   : > { %v182_v11 = vmul.f32 %v484_v7, %v175_v8  ;;  %v181_v12 = vmul.f32 %v484_v7, %v171_v9 }
  0x98   : > { %v184_v18 = vadd.f32 %v182_v11, %v168_v14  ;;  %v183_v19 = vadd.f32 %v181_v12, %v167_v15 }
  0x9a   : > { %v187_v16 = vpop.permute.xlu1 %186  ;;  %v191_v17 = vpop.permute.xlu0 %190 }
  0x9b   : > { %v197_v20 = vmul.f32 %v485_v13, %v187_v16  ;;  %v198_v21 = vmul.f32 %v485_v13, %v191_v17 }
  0x9d   : > { %v199_v23 = vadd.f32 %v197_v20, %v183_v19  ;;  %v200_v24 = vadd.f32 %v198_v21, %v184_v18 }
  0x9f   : > { %v596_v25 = vadd.f32 %v486_v22, %v199_v23  ;;  %v598_v26 = vadd.f32 %v486_v22, %v200_v24 }
  0xa1   : > { %v207_v27 = vand.u32 2147483647, %v596_v25  ;;  %v210_v28 = vand.u32 2139095040, %v596_v25  ;;  %v314_v29 = vand.u32 2139095040, %v598_v26  ;;  %v311_v32 = vand.u32 2147483647, %v598_v26 }
  0xa2   : > { %vm209_vm14 = vcmp.lt.s32.totalorder %v596_v25, 0 }
  0xa3   : > { %v211_v30 = vshrl.u32 %v210_v28, 23  ;;  %v214_v31 = vand.u32 8388607, %v207_v27  ;;  %v315_v33 = vshrl.u32 %v314_v29, 23  ;;  %v608_v38 = vand.u32 8388607, %v311_v32 }
  0xa4   : > { %vm208_vm15 = vcmp.le.f32.partialorder %v207_v27, 0.7853982 }
  0xa5   : > { %v487_v34 = vadd.s32 4294967169, %v211_v30  ;;  %v491_v35 = vadd.s32 4294967169, %v315_v33  ;;  %v215_v37 = vor.u32 8388608, %v214_v31  ;;  %v319_v45 = vor.u32 8388608, %v608_v38 }
  0xa7   : > { %v217_v36 = vadd.s32 1, %v487_v34  ;;  %v321_v39 = vadd.s32 1, %v491_v35  ;;  %v610_v44 = vshll.u32 %v215_v37, 8 }
  0xa9   : > { %vm218_vm0 = vcmp.gt.s32.totalorder %v217_v36, 0  ;;  %vm322_vm1 = vcmp.gt.s32.totalorder %v321_v39, 0 }
  0xaa   : > { %v219_v40 = vsel %vm218_vm0, %v217_v36, 0  ;;  %v323_v43 = vsel %vm322_vm1, %v321_v39, 0  ;;  %v359_v39 = vshll.u32 %v319_v45, 8  ;;  %vm313_vm0 = vcmp.lt.s32.totalorder %v598_v26, 0 }
  0xab   : > { %v220_v41 = vshrl.u32 %v219_v40, 5  ;;  %v221_v42 = vand.u32 31, %v219_v40  ;;  %v613_v49 = vshrl.u32 %v323_v43, 5  ;;  %v325_v50 = vand.u32 31, %v323_v43 }
  0xac   : > { %vm312_vm1 = vcmp.le.f32.partialorder %v311_v32, 0.7853982 }
  0xad   : > { %v222_v46 = vsub.s32 32, %v221_v42  ;;  %v224_v48 = vshll.u32 %v547_v47, %v221_v42  ;;  %v227_v52 = vshll.u32 %v548_v51, %v221_v42  ;;  %v230_v54 = vshll.u32 %v549_v53, %v221_v42 }
  0xae   : > { %v233_v56 = vshll.u32 %v550_v55, %v221_v42  ;;  %v236_v58 = vshll.u32 %v551_v57, %v221_v42  ;;  %vm239_vm2 = vcmp.lt.s32.totalorder %v220_v41, 1  ;;  %vm240_vm3 = vcmp.lt.s32.totalorder %v220_v41, 2 }
  0xaf   : > { %v225_v59 = vshrl.u32 %v548_v51, %v222_v46  ;;  %v228_v60 = vshrl.u32 %v549_v53, %v222_v46  ;;  %v231_v61 = vshrl.u32 %v550_v55, %v222_v46  ;;  %v223_v62 = vshrl.u32 %v547_v47, %v222_v46 }
  0xb0   : > { %v234_v63 = vshrl.u32 %v551_v57, %v222_v46  ;;  %v237_v1 = vshrl.u32 %v552_v0, %v222_v46  ;;  %v326_v5 = vsub.s32 32, %v325_v50  ;;  %vm241_vm4 = vcmp.lt.s32.totalorder %v220_v41, 3 }
  0xb1   : > { %v226_v2 = vor.u32 %v225_v59, %v224_v48  ;;  %v229_v3 = vor.u32 %v228_v60, %v227_v52  ;;  %v232_v4 = vor.u32 %v231_v61, %v230_v54  ;;  %vm242_vm5 = vcmp.lt.s32.totalorder %v220_v41, 4 }
  0xb2   : > { %v235_v6 = vor.u32 %v234_v63, %v233_v56  ;;  %v238_v7 = vor.u32 %v237_v1, %v236_v58  ;;  %v328_v15 = vshll.u32 %v547_v47, %v325_v50  ;;  %v329_v18 = vshrl.u32 %v548_v51, %v326_v5 }
  0xb3   : > { %v243_v8 = vsel %vm239_vm2, %v223_v62, %v226_v2  ;;  %v244_v9 = vsel %vm242_vm5, %v232_v4, 2102212464  ;;  %v247_v10 = vsel %vm239_vm2, %v226_v2, %v229_v3  ;;  %v251_v11 = vsel %vm239_vm2, %v229_v3, %v232_v4 }
  0xb4   : > { %v245_v12 = vsel %vm241_vm4, %v229_v3, %v244_v9  ;;  %v248_v13 = vsel %vm242_vm5, %v235_v6, 920167782  ;;  %v252_v14 = vsel %vm242_vm5, %v238_v7, 1326507024  ;;  %v331_v19 = vshll.u32 %v548_v51, %v325_v50 }
  0xb5   : > { %v249_v16 = vsel %vm241_vm4, %v232_v4, %v248_v13  ;;  %v253_v17 = vsel %vm241_vm4, %v235_v6, %v252_v14  ;;  %v246_v20 = vsel %vm240_vm3, %v243_v8, %v245_v12  ;;  %v332_v23 = vshrl.u32 %v549_v53, %v326_v5 }
  0xb6   : > { %v250_v21 = vsel %vm240_vm3, %v247_v10, %v249_v16  ;;  %v254_v22 = vsel %vm240_vm3, %v251_v11, %v253_v17  ;;  %v330_v31 = vor.u32 %v329_v18, %v328_v15  ;;  %v334_v34 = vshll.u32 %v549_v53, %v325_v50 }
  0xb7   : > { %v622_v24 = vmul.u32.u64.low %v610_v44, %v254_v22  ;;  %v623_v28 = vmul.u32.u64.high %v610_v44, %v254_v22, %v622_v24  ;;  %v626_v29 = vmul.u32.u64.low %v610_v44, %v250_v21  ;;  %v627_v30 = vmul.u32.u64.high %v610_v44, %v250_v21, %v626_v29 }
  0xb8   : > { %v333_v33 = vor.u32 %v332_v23, %v331_v19  ;;  %v335_v35 = vshrl.u32 %v550_v55, %v326_v5  ;;  %v337_v36 = vshll.u32 %v550_v55, %v325_v50  ;;  %v338_v37 = vshrl.u32 %v551_v57, %v326_v5 }
  0xb9   : > { %v341_v38 = vshrl.u32 %v552_v0, %v326_v5  ;;  %v262_v40 = vmul.u32 %v610_v44, %v246_v20  ;;  %v327_v41 = vshrl.u32 %v547_v47, %v326_v5  ;;  %v340_v43 = vshll.u32 %v551_v57, %v325_v50 }
  0xba   : > { %v336_v42 = vor.u32 %v335_v35, %v334_v34  ;;  %vm264_vm6 = vc.u32 %v623_v28, %v626_v29  ;;  %v265_v46 = vadd.s32 1, %v627_v30  ;;  %v339_v48 = vor.u32 %v338_v37, %v337_v36 }
  0xbb   : > { %vm343_vm7 = vcmp.lt.s32.totalorder %v613_v49, 1  ;;  %v342_v51 = vor.u32 %v341_v38, %v340_v43  ;;  %vm345_vm8 = vcmp.lt.s32.totalorder %v613_v49, 3  ;;  %vm346_vm9 = vcmp.lt.s32.totalorder %v613_v49, 4 }
  0xbc   : > { %v351_v52 = vsel %vm343_vm7, %v330_v31, %v333_v33  ;;  %v266_v45 = vsel %vm264_vm6, %v265_v46, %v627_v30  ;;  %v348_v53 = vsel %vm346_vm9, %v336_v42, 2102212464  ;;  %v352_v44 = vsel %vm346_vm9, %v339_v48, 920167782 }
  0xbd   : > { %v355_v47 = vsel %vm343_vm7, %v333_v33, %v336_v42  ;;  %v267_v54 = vadd.s32 %v266_v45, %v262_v40  ;;  %vm344_vm10 = vcmp.lt.s32.totalorder %v613_v49, 2  ;;  %v353_v50 = vsel %vm345_vm8, %v336_v42, %v352_v44 }
  0xbe   : > { %v356_v55 = vsel %vm346_vm9, %v342_v51, 1326507024  ;;  %v347_v56 = vsel %vm343_vm7, %v327_v41, %v330_v31  ;;  %v349_v57 = vsel %vm345_vm8, %v333_v33, %v348_v53  ;;  %v354_v58 = vsel %vm344_vm10, %v351_v52, %v353_v50 }
  0xbf   : > { %v357_v59 = vsel %vm345_vm8, %v339_v48, %v356_v55  ;;  %v268_v60 = vadd.s32 536870912, %v267_v54  ;;  %v637_v62 = vmul.u32.u64.low %v359_v39, %v354_v58  ;;  %v638_v63 = vmul.u32.u64.high %v359_v39, %v354_v58, %v637_v62 }
  0xc0   : > { %v358_v61 = vsel %vm344_vm10, %v355_v47, %v357_v59  ;;  %v350_v3 = vsel %vm344_vm10, %v347_v56, %v349_v57  ;;  %v263_v19 = vadd.s32 %v626_v29, %v623_v28  ;;  %vm415_vm4 = vcmask 392192  }
  0xc1   : > { %v640_v0 = vmul.u32.u64.low %v359_v39, %v358_v61  ;;  %v641_v1 = vmul.u32.u64.high %v359_v39, %v358_v61, %v640_v0  ;;  %v269_v2 = vshrl.u32 %v268_v60, 30  ;;  %v369_v5 = vadd.s32 1, %v638_v63 }
  0xc2   : > { %v366_v49 = vmul.u32 %v359_v39, %v350_v3  ;;  %vm299_vm6 = vweird.f32 %v596_v25  ;;  %vm403_vm10 = vweird.f32 %v598_v26 }
  0xc3   : > { %v270_v4 = vshll.u32 %v269_v2, 30  ;;  %vm368_vm11 = vc.u32 %v641_v1, %v637_v62  ;;  %v367_v40 = vadd.s32 %v637_v62, %v641_v1  ;;  %v293_v29 = vsub.s32 4, %v269_v2 }
  0xc4   : > { %v370_v7 = vsel %vm368_vm11, %v369_v5, %v638_v63 }
  0xc5   : > { %v271_v6 = vsub.s32 %v267_v54, %v270_v4  ;;  %v371_v8 = vadd.s32 %v370_v7, %v366_v49  ;;  %v294_v44 = vsel %vm209_vm14, %v293_v29, %v269_v2 }
  0xc6   : > { %v296_v50 = vsel %vm208_vm15, 0, %v294_v44 }
  0xc7   : > { %v273_v9 = vsub.s32 0, %v271_v6  ;;  %v372_v10 = vadd.s32 536870912, %v371_v8  ;;  %v300_v59 = vadd.s32 3, %v296_v50 }
  0xc9   : > { %v488_v11 = vmin.u32 %v273_v9, %v271_v6  ;;  %v373_v12 = vshrl.u32 %v372_v10, 30  ;;  %v301_v62 = vand.u32 3, %v300_v59 }
  0xcb   : > { %v275_v13 = vclz %v488_v11  ;;  %v374_v14 = vshll.u32 %v373_v12, 30  ;;  %v397_v58 = vsub.s32 4, %v373_v12  ;;  %vm306_vm2 = vcmp.eq.s32.totalorder %v301_v62, 2 }
  0xcc   : > { %vm303_vm3 = vcmp.eq.s32.totalorder %v301_v62, 0  ;;  %vm302_vm5 = vcmp.lt.s32.totalorder %v301_v62, 2 }
  0xcd   : > { %v489_v15 = vadd.s32 4294967294, %v275_v13  ;;  %v375_v16 = vsub.s32 %v371_v8, %v374_v14  ;;  %v398_v61 = vsel %vm313_vm0, %v397_v58, %v373_v12 }
  0xce   : > { %v400_v1 = vsel %vm312_vm1, 0, %v398_v61 }
  0xcf   : > { %vm490_vm12 = vcmp.lt.s32.totalorder %v489_v15, 0  ;;  %v377_v18 = vsub.s32 0, %v375_v16  ;;  %v404_v49 = vadd.s32 3, %v400_v1 }
  0xd0   : > { %v278_v17 = vsel %vm490_vm12, 0, %v489_v15 }
  0xd1   : > { %v279_v20 = vsub.s32 32, %v278_v17  ;;  %v283_v21 = vsub.s32 4294967266, %v278_v17  ;;  %v492_v22 = vmin.u32 %v377_v18, %v375_v16  ;;  %v280_v23 = vshll.u32 %v271_v6, %v278_v17 }
  0xd2   : > { %v405_v8 = vand.u32 3, %v404_v49 }
  0xd3   : > { %v281_v24 = vshrl.u32 %v263_v19, %v279_v20  ;;  %v284_v30 = vadd.s32 127, %v283_v21  ;;  %v379_v31 = vclz %v492_v22 }
  0xd4   : > { %vm410_vm7 = vcmp.eq.s32.totalorder %v405_v8, 2  ;;  %vm407_vm8 = vcmp.eq.s32.totalorder %v405_v8, 0  ;;  %vm406_vm9 = vcmp.lt.s32.totalorder %v405_v8, 2 }
  0xd5   : > { %v282_v33 = vor.u32 %v281_v24, %v280_v23  ;;  %v285_v34 = vshll.u32 %v284_v30, 23  ;;  %v493_v35 = vadd.s32 4294967294, %v379_v31 }
  0xd7   : > { %v286_v36 = vor.u32 4788187, %v285_v34  ;;  %vm494_vm13 = vcmp.lt.s32.totalorder %v493_v35, 0  ;;  %v289_v38 = vcvt.s32.f32 %v282_v33 }
  0xd8   : > { %v382_v39 = vsel %vm494_vm13, 0, %v493_v35 }
  0xd9   : > { %v287_v37 = vand.u32 2147483647, %v286_v36  ;;  %v383_v41 = vsub.s32 32, %v382_v39  ;;  %v387_v42 = vsub.s32 4294967266, %v382_v39  ;;  %v384_v43 = vshll.u32 %v375_v16, %v382_v39 }
  0xdb   : > { %v290_v28 = vmul.f32 %v289_v38, %v287_v37  ;;  %v385_v46 = vshrl.u32 %v367_v40, %v383_v41  ;;  %v388_v48 = vadd.s32 127, %v387_v42 }
  0xdd   : > { %v291_v51 = vxor.u32 2147483648, %v290_v28  ;;  %v386_v52 = vor.u32 %v385_v46, %v384_v43  ;;  %v389_v45 = vshll.u32 %v388_v48, 23 }
  0xdf   : > { %v292_v53 = vsel %vm209_vm14, %v291_v51, %v290_v28  ;;  %v390_v54 = vor.u32 4788187, %v389_v45  ;;  %v393_v56 = vcvt.s32.f32 %v386_v52 }
  0xe0   : > { %v295_v47 = vsel %vm208_vm15, %v596_v25, %v292_v53 }
  0xe1   : > { %528 = vcosq.f32 %v295_v47  ;;  %v391_v55 = vand.u32 2147483647, %v390_v54 }
  0xe2   : > { %530 = vsinq.f32 %v295_v47 }
  0xe3   : > { %v394_v57 = vmul.f32 %v393_v56, %v391_v55 }
  0xe5   : > { %v395_v60 = vxor.u32 2147483648, %v394_v57 }
  0xe7   : > { %v396_v27 = vsel %vm313_vm0, %v395_v60, %v394_v57 }
  0xe8   : > { %v399_v63 = vsel %vm312_vm1, %v598_v26, %v396_v27 }
  0xe9   : > { %532 = vcosq.f32 %v399_v63 }
  0xea   : > { %534 = vsinq.f32 %v399_v63 }
  0xeb   : > { %v529_v0 = vpop.eup %528 }
  0xec   : > { %v531_v2 = vpop.eup %530  ;;  %v307_v3 = vxor.u32 2147483648, %v529_v0 }
  0xed   : > { %v304_v4 = vxor.u32 2147483648, %v531_v2 }
  0xee   : > { %v308_v5 = vsel %vm306_vm2, %v307_v3, %v531_v2 }
  0xef   : > { %v305_v32 = vsel %vm303_vm3, %v529_v0, %v304_v4 }
  0xf0   : > { %v309_v6 = vsel %vm302_vm5, %v305_v32, %v308_v5 }
  0xf1   : > { %v310_v7 = vsel %vm299_vm6, nan, %v309_v6 }
  0xf2   : > { %416 = vst.msk [vmem:[%s145_s26] sm:$0xff] %vm415_vm4, %v310_v7 }
  0xf3   : > { %v533_v9 = vpop.eup %532 }
  0xf4   : > { %v535_v10 = vpop.eup %534  ;;  %v411_v11 = vxor.u32 2147483648, %v533_v9 }
  0xf5   : > { %v408_v12 = vxor.u32 2147483648, %v535_v10 }
  0xf6   : > { %v412_v13 = vsel %vm410_vm7, %v411_v11, %v535_v10 }
  0xf7   : > { %v409_v14 = vsel %vm407_vm8, %v533_v9, %v408_v12 }
  0xf8   : > { %v413_v15 = vsel %vm406_vm9, %v409_v14, %v412_v13 }
  0xf9   : > { %v414_v16 = vsel %vm403_vm10, nan, %v413_v15 }
  0xfa   : > { %417 = vst.msk [vmem:[%s145_s26 + $0x8] sm:$0xff] %vm415_vm4, %v414_v16 }
  0xfb PF: > { %s12_s9 = sadd.s32 1, %s542_s9  }
  0xfc   : > { %p9_p4 = scmp.ge.s32.totalorder %s12_s9, 6  }
  0xfe   :  { %11 = sbr.rel (!%p9_p4) target bundleno = 1 (0x1), region = 58 }

</bundles_post_ra>
